<compile_context>
chip_gen: v6e
topology: v6e:2x2x1
jax: 0.10.0
libtpu: 0.0.40
codegen_flags: <defaults>
</compile_context>

<pallas_src>
import jax
import jax.numpy as jnp
from jax.experimental import pallas as pl
from jax.experimental.pallas import tpu as pltpu

_MIB = 1024 * 1024


def _round_up(x, m):
    return (x + m - 1) // m * m


def _round_down(x, m):
    return x // m * m


def _vmem_budget_bytes():
    """Generation-aware VMEM budget (~half of physical capacity, >= 32 MiB)."""
    try:
        cap = int(pltpu.get_tpu_info().vmem_capacity_bytes)
    except Exception:
        cap = 64 * _MIB                      # conservative (v7x-sized) fallback
    return int(max(32 * _MIB, min(cap // 2, 64 * _MIB)))


def _attn_from_pools(max_pool, sum_pool, inv_hw, w1, w2):
    """sigmoid(fc2(relu(fc1(max))) + fc2(relu(fc1(avg)))) -> (C, 1)."""
    c = max_pool.shape[0]
    # Pack [max | avg] as the two columns of one (C, 2) matrix so the shared
    # MLP is a single w1@pooled / w2@hidden matmul pair, not four (., 1) dots.
    col = jax.lax.broadcasted_iota(jnp.int32, (c, 2), 1)
    pooled = jnp.where(col == 0, max_pool, sum_pool * inv_hw)             # (C, 2)
    hidden = jnp.maximum(
        jnp.dot(w1, pooled, preferred_element_type=jnp.float32), 0.0)     # (C/r, 2)
    y = jnp.dot(w2, hidden, preferred_element_type=jnp.float32)           # (C, 2)
    # Column sum == fc2(h_max) + fc2(h_avg), then sigmoid.
    return jax.nn.sigmoid(jnp.sum(y, axis=-1, keepdims=True))             # (C, 1)


# ---------------------------------------------------------------------------
# Fused single-pass kernel: pool + MLP + scale in one grid step per batch.
# ---------------------------------------------------------------------------
def _make_fused_kernel(hw):
    inv_hw = 1.0 / float(hw)

    def fused_kernel(x_ref, w1_ref, w2_ref, o_ref):
        x = x_ref[0]                                   # (C, hw): the single HBM
        xf = x.astype(jnp.float32)                     # read feeds both reductions
        max_pool = jnp.max(xf, axis=-1, keepdims=True)     # and the final scale.
        sum_pool = jnp.sum(xf, axis=-1, keepdims=True)
        attn = _attn_from_pools(max_pool, sum_pool, inv_hw,
                                w1_ref[...], w2_ref[...])               # (C, 1)
        o_ref[0] = (xf * attn).astype(o_ref.dtype)

    return fused_kernel


# ---------------------------------------------------------------------------
# Fallback two-phase kernels (huge C * HW slabs only).
# ---------------------------------------------------------------------------
def _make_pool_kernel(hw, thw, needs_mask):
    inv_hw = 1.0 / float(hw)

    def pool_kernel(x_ref, w1_ref, w2_ref, attn_ref, max_sc, sum_sc):
        k = pl.program_id(1)
        last = pl.num_programs(1) - 1

        @pl.when(k == 0)
        def _():
            max_sc[...] = jnp.full_like(max_sc, -jnp.inf)
            sum_sc[...] = jnp.zeros_like(sum_sc)

        x = x_ref[0].astype(jnp.float32)               # (C, thw), single load
        # Wrapper padding is zeros -> the running sum never needs a mask.
        sum_sc[...] = sum_sc[...] + jnp.sum(x, axis=-1, keepdims=True)

        if needs_mask:
            # Only the final spatial tile contains padded lanes; interior tiles
            # keep the cheap unmasked max path (VPU headroom on v7x).
            @pl.when(k < last)
            def _():
                max_sc[...] = jnp.maximum(
                    max_sc[...], jnp.max(x, axis=-1, keepdims=True))

            @pl.when(k == last)
            def _():
                lane = jax.lax.broadcasted_iota(jnp.int32, x.shape, 1) + k * thw
                x_m = jnp.where(lane < hw, x, -jnp.inf)
                max_sc[...] = jnp.maximum(
                    max_sc[...], jnp.max(x_m, axis=-1, keepdims=True))
        else:
            max_sc[...] = jnp.maximum(
                max_sc[...], jnp.max(x, axis=-1, keepdims=True))

        @pl.when(k == last)
        def _():
            attn_ref[0] = _attn_from_pools(
                max_sc[...], sum_sc[...], inv_hw,
                w1_ref[...], w2_ref[...]).astype(attn_ref.dtype)

    return pool_kernel


def _scale_kernel(x_ref, attn_ref, o_ref):
    # (1, C, thw) * (1, C, 1): per-channel scale, broadcast over lanes.
    o_ref[0] = (x_ref[0] * attn_ref[0]).astype(o_ref.dtype)


# ---------------------------------------------------------------------------
# Wrapper.
# ---------------------------------------------------------------------------
def channel_attention(x, w1, w2, *, force_two_phase=False, tile_hw=None):
    """x: (B, C, H, W), w1: (C//r, C), w2: (C, C//r)."""
    b, c, h, w = x.shape
    hw = h * w
    x_flat = x.reshape(b, c, hw)

    budget = _vmem_budget_bytes()
    itemsize = jnp.dtype(x.dtype).itemsize
    slab_bytes = c * hw * itemsize
    w_bytes = (w1.size + w2.size) * jnp.dtype(w1.dtype).itemsize

    # ------------- fused single-pass path: 1R + 1W HBM traffic --------------
    # Pallas double-buffers the (1, C, hw) input and output slabs (~4 slabs).
    if not force_two_phase and 4 * slab_bytes + 4 * w_bytes + 1 * _MIB <= budget:
        out = pl.pallas_call(
            _make_fused_kernel(hw),
            out_shape=jax.ShapeDtypeStruct((b, c, hw), x.dtype),
            grid_spec=pltpu.PrefetchScalarGridSpec(
                num_scalar_prefetch=0,
                grid=(b,),
                in_specs=[
                    pl.BlockSpec((1, c, hw), lambda i: (i, 0, 0)),
                    pl.BlockSpec(w1.shape, lambda i: (0, 0)),
                    pl.BlockSpec(w2.shape, lambda i: (0, 0)),
                ],
                out_specs=pl.BlockSpec((1, c, hw), lambda i: (i, 0, 0)),
            ),
            compiler_params=pltpu.CompilerParams(
                dimension_semantics=("parallel",),
                vmem_limit_bytes=budget),
        )(x_flat, w1, w2)
        return out.reshape(b, c, h, w)

    # ------------- two-phase fallback: slab too big for VMEM ----------------
    # TODO(synk): on v7x with B == 1, split the phase-1 HW reduction across the
    # two TensorCores (partial max/sum per half + tiny combine epilogue).

    # Byte-sized, lane-dense spatial tile: ~2 MiB per (C, thw) block, clamped
    # so ~5 resident double-buffered blocks stay inside the VMEM budget.
    lane_hw = _round_up(hw, 128)
    if tile_hw is not None:
        thw = int(tile_hw)
    else:
        thw = max(128, _round_down((2 * _MIB) // (itemsize * c), 128))
        cap = max(128, _round_down(budget // (5 * itemsize * c), 128))
        thw = min(thw, cap)
    thw = min(thw, lane_hw)
    hw_pad = _round_up(hw, thw)
    n_k = hw_pad // thw
    needs_mask = hw_pad != hw

    if needs_mask:
        # Zero padding keeps the running sum exact with no per-tile mask; the
        # running max masks only on the last tile inside the kernel.
        x_flat = jnp.pad(x_flat, ((0, 0), (0, 0), (0, hw_pad - hw)))

    # Phase 1: tiled max/sum pooling + fused MLP -> (B, C, 1) attention.
    attn = pl.pallas_call(
        _make_pool_kernel(hw, thw, needs_mask),
        out_shape=jax.ShapeDtypeStruct((b, c, 1), jnp.float32),
        grid_spec=pltpu.PrefetchScalarGridSpec(
            num_scalar_prefetch=0,
            grid=(b, n_k),
            in_specs=[
                pl.BlockSpec((1, c, thw), lambda i, k: (i, 0, k)),
                pl.BlockSpec(w1.shape, lambda i, k: (0, 0)),
                pl.BlockSpec(w2.shape, lambda i, k: (0, 0)),
            ],
            out_specs=pl.BlockSpec((1, c, 1), lambda i, k: (i, 0, 0)),
            scratch_shapes=[pltpu.VMEM((c, 1), jnp.float32),
                            pltpu.VMEM((c, 1), jnp.float32)],
        ),
        compiler_params=pltpu.CompilerParams(
            dimension_semantics=("parallel", "arbitrary"),
            vmem_limit_bytes=budget),
    )(x_flat, w1, w2)

    # Phase 2: lane-dense scale pass, fully parallel grid (uses both v7x TCs
    # even at B=1).
    out_pad = pl.pallas_call(
        _scale_kernel,
        out_shape=jax.ShapeDtypeStruct((b, c, hw_pad), x.dtype),
        grid_spec=pltpu.PrefetchScalarGridSpec(
            num_scalar_prefetch=0,
            grid=(b, n_k),
            in_specs=[
                pl.BlockSpec((1, c, thw), lambda i, k: (i, 0, k)),
                pl.BlockSpec((1, c, 1), lambda i, k: (i, 0, 0)),
            ],
            out_specs=pl.BlockSpec((1, c, thw), lambda i, k: (i, 0, k)),
        ),
        compiler_params=pltpu.CompilerParams(
            dimension_semantics=("parallel", "parallel"),
            vmem_limit_bytes=budget),
    )(x_flat, attn)

    if needs_mask:
        out_pad = out_pad[:, :, :hw]
    return out_pad.reshape(b, c, h, w)


def channel_attention_ref(x, w1, w2):
    """Pure-JAX reference matching the PyTorch forward."""
    b, c, h, w = x.shape
    max_pool = jnp.max(x, axis=(2, 3))             # (B, C)
    avg_pool = jnp.mean(x, axis=(2, 3))            # (B, C)
    h_max = jax.nn.relu(max_pool @ w1.T)
    h_avg = jax.nn.relu(avg_pool @ w1.T)
    y = h_max @ w2.T + h_avg @ w2.T
    attn = jax.nn.sigmoid(y).reshape(b, c, 1, 1)
    return x * attn


if __name__ == "__main__":
    RATIO = 4

    key = jax.random.PRNGKey(0)
    kx, k1, k2, kx2, k3, k4, kx3, k5, k6 = jax.random.split(key, 9)

    # Case 1: fused single-pass path, H*W a multiple of 128.
    B, C, H, W = 2, 8, 16, 16
    HID = C // RATIO
    x = jax.random.normal(kx, (B, C, H, W), dtype=jnp.float32)
    w1 = jax.random.normal(k1, (HID, C), dtype=jnp.float32) * 0.1
    w2 = jax.random.normal(k2, (C, HID), dtype=jnp.float32) * 0.1
    out = jax.block_until_ready(channel_attention(x, w1, w2))
    ref = channel_attention_ref(x, w1, w2)
    assert out.shape == (B, C, H, W)
    assert jnp.allclose(out, ref, atol=1e-5, rtol=1e-5), "mismatch (case 1, fused)"

    # Case 2: fused path with H*W = 196 (not a multiple of 128) — exercises the
    # no-pad / no-slice full-extent-block path.
    B2, C2, H2, W2 = 1, 16, 14, 14
    HID2 = C2 // RATIO
    x2 = jax.random.normal(kx2, (B2, C2, H2, W2), dtype=jnp.float32)
    w1b = jax.random.normal(k3, (HID2, C2), dtype=jnp.float32) * 0.1
    w2b = jax.random.normal(k4, (C2, HID2), dtype=jnp.float32) * 0.1
    out2 = jax.block_until_ready(channel_attention(x2, w1b, w2b))
    ref2 = channel_attention_ref(x2, w1b, w2b)
    assert out2.shape == (B2, C2, H2, W2)
    assert jnp.allclose(out2, ref2, atol=1e-5, rtol=1e-5), "mismatch (case 2, fused)"

    # Case 3: forced two-phase fallback with a small tile so multi-tile
    # accumulation, last-tile masking and the scale pass are all exercised.
    B3, C3, H3, W3 = 2, 8, 14, 14
    HID3 = C3 // RATIO
    x3 = jax.random.normal(kx3, (B3, C3, H3, W3), dtype=jnp.float32)
    w1c = jax.random.normal(k5, (HID3, C3), dtype=jnp.float32) * 0.1
    w2c = jax.random.normal(k6, (C3, HID3), dtype=jnp.float32) * 0.1
    out3 = jax.block_until_ready(
        channel_attention(x3, w1c, w2c, force_two_phase=True, tile_hw=128))
    ref3 = channel_attention_ref(x3, w1c, w2c)
    assert out3.shape == (B3, C3, H3, W3)
    assert jnp.allclose(out3, ref3, atol=1e-5, rtol=1e-5), "mismatch (case 3, two-phase)"

    print("KERNEL_OK")
</pallas_src>

<mosaic_0001>
module attributes {stable_mosaic.version = 11 : i64} {
  func.func @fused_kernel(%arg0: i32, %arg1: memref<1x8x256xf32, #tpu.memory_space<vmem>>, %arg2: memref<2x8xf32, #tpu.memory_space<vmem>>, %arg3: memref<8x2xf32, #tpu.memory_space<vmem>>, %arg4: memref<1x8x256xf32, #tpu.memory_space<vmem>>) attributes {dimension_semantics = [#tpu.dimension_semantics<parallel>], iteration_bounds = array<i64: 2>, scalar_prefetch = 0 : i64, scratch_operands = 0 : i64, tpu.core_type = #tpu.core_type<tc>, window_params = [{transform_indices = @transform_0, window_bounds = array<i64: 1, 8, 256>}, {pipeline_mode = #tpu.pipeline_mode<synchronous>, transform_indices = @transform_1, window_bounds = array<i64: 2, 8>}, {pipeline_mode = #tpu.pipeline_mode<synchronous>, transform_indices = @transform_2, window_bounds = array<i64: 8, 2>}, {transform_indices = @transform_3, window_bounds = array<i64: 1, 8, 256>}]} {
    %c0 = arith.constant 0 : index
    %c0_0 = arith.constant 0 : index
    %c0_1 = arith.constant 0 : index
    %0 = vector.load %arg1[%c0, %c0_0, %c0_1] : memref<1x8x256xf32, #tpu.memory_space<vmem>>, vector<1x8x256xf32>
    %1 = vector.shape_cast %0 : vector<1x8x256xf32> to vector<8x256xf32>
    %cst = arith.constant dense<0xFF800000> : vector<8xf32>
    %2 = vector.multi_reduction <maximumf>, %1, %cst [1] : vector<8x256xf32> to vector<8xf32>
    %3 = vector.shape_cast %2 : vector<8xf32> to vector<8x1xf32>
    %cst_2 = arith.constant dense<0.000000e+00> : vector<8xf32>
    %4 = vector.multi_reduction <add>, %1, %cst_2 [1] : vector<8x256xf32> to vector<8xf32>
    %5 = vector.shape_cast %4 : vector<8xf32> to vector<8x1xf32>
    %c0_3 = arith.constant 0 : index
    %c0_4 = arith.constant 0 : index
    %6 = vector.load %arg2[%c0_3, %c0_4] : memref<2x8xf32, #tpu.memory_space<vmem>>, vector<2x8xf32>
    %c0_5 = arith.constant 0 : index
    %c0_6 = arith.constant 0 : index
    %7 = vector.load %arg3[%c0_5, %c0_6] : memref<8x2xf32, #tpu.memory_space<vmem>>, vector<8x2xf32>
    %8 = tpu.iota {dimensions = array<i32: 1>} : vector<8x2xi32>
    %c0_i32 = arith.constant 0 : i32
    %9 = vector.broadcast %c0_i32 : i32 to vector<8x2xi32>
    %10 = arith.cmpi eq, %8, %9 : vector<8x2xi32>
    %cst_7 = arith.constant 3.906250e-03 : f32
    %11 = vector.broadcast %cst_7 : f32 to vector<8x1xf32>
    %12 = arith.mulf %5, %11 : vector<8x1xf32>
    %13 = vector.shape_cast %3 : vector<8x1xf32> to vector<8x1xf32>
    %14 = vector.broadcast %13 : vector<8x1xf32> to vector<8x2xf32>
    %15 = vector.shape_cast %12 : vector<8x1xf32> to vector<8x1xf32>
    %16 = vector.broadcast %15 : vector<8x1xf32> to vector<8x2xf32>
    %17 = arith.select %10, %14, %16 : vector<8x2xi1>, vector<8x2xf32>
    %cst_8 = arith.constant dense<0.000000e+00> : vector<2x2xf32>
    %18 = tpu.matmul %6, %17, %cst_8 {dimension_numbers = #tpu.dot_dimension_numbers<[1], [0], [0], [1], [0, 0, 1, 1], [], []>} : vector<2x8xf32>, vector<8x2xf32>, vector<2x2xf32> -> vector<2x2xf32>
    %cst_9 = arith.constant 0.000000e+00 : f32
    %19 = vector.broadcast %cst_9 : f32 to vector<2x2xf32>
    %20 = arith.maximumf %18, %19 : vector<2x2xf32>
    %cst_10 = arith.constant dense<0.000000e+00> : vector<8x2xf32>
    %21 = tpu.matmul %7, %20, %cst_10 {dimension_numbers = #tpu.dot_dimension_numbers<[1], [0], [0], [1], [0, 0, 1, 1], [], []>} : vector<8x2xf32>, vector<2x2xf32>, vector<8x2xf32> -> vector<8x2xf32>
    %cst_11 = arith.constant dense<0.000000e+00> : vector<8xf32>
    %22 = vector.multi_reduction <add>, %21, %cst_11 [1] : vector<8x2xf32> to vector<8xf32>
    %23 = vector.shape_cast %22 : vector<8xf32> to vector<8x1xf32>
    %24 = arith.negf %23 : vector<8x1xf32>
    %25 = math.exp %24 : vector<8x1xf32>
    %cst_12 = arith.constant 1.000000e+00 : f32
    %26 = vector.broadcast %cst_12 : f32 to vector<8x1xf32>
    %27 = arith.addf %26, %25 : vector<8x1xf32>
    %28 = arith.divf %26, %27 : vector<8x1xf32>
    %29 = vector.broadcast %28 : vector<8x1xf32> to vector<8x256xf32>
    %30 = arith.mulf %1, %29 : vector<8x256xf32>
    %c0_13 = arith.constant 0 : index
    %c0_14 = arith.constant 0 : index
    %c0_15 = arith.constant 0 : index
    %31 = vector.load %arg4[%c0_13, %c0_14, %c0_15] : memref<1x8x256xf32, #tpu.memory_space<vmem>>, vector<1x8x256xf32>
    %32 = vector.shape_cast %31 : vector<1x8x256xf32> to vector<8x256xf32>
    %33 = vector.shape_cast %30 : vector<8x256xf32> to vector<1x8x256xf32>
    tpu.vector_store %arg4[%c0_13, %c0_14, %c0_15], %33 {strides = array<i32>} : memref<1x8x256xf32, #tpu.memory_space<vmem>>, vector<1x8x256xf32>,
    return
  }
  func.func @transform_0(%arg0: i32) -> (i32, i32, i32) {
    %c0_i32 = arith.constant 0 : i32
    %c0_i32_0 = arith.constant 0 : i32
    %c0_i32_1 = arith.constant 0 : i32
    return %arg0, %c0_i32, %c0_i32_0 : i32, i32, i32
  }
  func.func @transform_1(%arg0: i32) -> (i32, i32) {
    %c0_i32 = arith.constant 0 : i32
    %c0_i32_0 = arith.constant 0 : i32
    %c0_i32_1 = arith.constant 0 : i32
    return %c0_i32, %c0_i32_0 : i32, i32
  }
  func.func @transform_2(%arg0: i32) -> (i32, i32) {
    %c0_i32 = arith.constant 0 : i32
    %c0_i32_0 = arith.constant 0 : i32
    %c0_i32_1 = arith.constant 0 : i32
    return %c0_i32, %c0_i32_0 : i32, i32
  }
  func.func @transform_3(%arg0: i32) -> (i32, i32, i32) {
    %c0_i32 = arith.constant 0 : i32
    %c0_i32_0 = arith.constant 0 : i32
    %c0_i32_1 = arith.constant 0 : i32
    return %arg0, %c0_i32, %c0_i32_0 : i32, i32, i32
  }
}

</mosaic_0001>

<bundles_post_ra>
// kernel: tpu_custom_call.1
= control target key start
LH: loop header
LB: loop body
LE: loop exit
PB: predicated region body
PF: predicated region fallthrough
CT: control target
= control target key end

     0   :  { %8 = vsyncpa [#allocation3], 0  ;;  %s814_s0 = inlined_call_operand.hbm [shape: f32[2,8,256], index: 0, kind: input, shape index: {}]   ;;  %s815_s1 = inlined_call_operand.vmem [shape: f32[2,8], index: 1, kind: input, shape index: {}]   ;;  %s816_s2 = inlined_call_operand.vmem [shape: f32[8,2], index: 2, kind: input, shape index: {}]   ;;  %s817_s3 = inlined_call_operand.hbm [shape: f32[2,8,256], index: 3, kind: output, shape index: {}]  }
   0x1   :  { %10 = vsyncpa [#allocation3 + $0x1], 0 }
   0x2   :  { %11 = vsyncpa [#allocation4], 0 }
   0x3   :  { %13 = vsyncpa [#allocation4 + $0x1], 0  ;;  %s657_s12 = smov 0   ;;  %s659_s13 = smov 0  }
   0x4   :  { %s661_s14 = smov 0   ;;  %s663_s15 = smov 0  }
   0x5 LB: > { %s678_s16 = sadd.s32 4294967295, %s631_s15   ;;  %s453_s17 = sadd.s32 4294967294, %s631_s15   ;;  %s631_s15 = sphi %s663_s15, %s834_s15   ;;  %s627_s14 = sphi %s661_s14, %s833_s14   ;;  %s623_s13 = sphi %s659_s13, %s832_s13   ;;  %s619_s12 = sphi %s657_s12, %s831_s12  }
   0x6   : > { %s682_s18 = sadd.s32 1, %s631_s15   ;;  %s26_s19 = sadd.s32 1, %s627_s14 }
   0x7   : > { %s23_s20 = ssub.s32 %s631_s15, %s682_s18  ;;  %p33_p0 = scmp.ne.s32.totalorder %s627_s14, %s623_s13 }
   0x8   : > { %p24_p1 = scmp.eq.s32.totalorder %s23_s20, 0  ;;  %p34_p2 = scmp.eq.s32.totalorder %s631_s15, 0 }
   0x9   : > { %p39_p3 = scmp.ne.s32.totalorder %s623_s13, %s619_s12  ;;  %p40_p4 = scmp.eq.s32.totalorder %s678_s16, 0 }
   0xa   : > { %s694_s21 = scalar_select %p24_p1, %s627_s14, %s26_s19  }
   0xb   : > { %p696_p5 = por %p34_p2, %p33_p0  ;;  %p700_p6 = por %p40_p4, %p39_p3 }
   0xc   : > { %p105_p7 = scmp.eq.s32.totalorder %s678_s16, 1  ;;  %p111_p8 = scmp.eq.s32.totalorder %s453_s17, 1 }
   0xd   : > { %s821_s23 = scalar_select %p700_p6, 1, 0 }
   0xe   : > { %p499_p10 = scmp.lt.s32.totalorder %s631_s15, 2  ;;  %p707_p11 = por %p105_p7, %p33_p0 }
   0xf   : > { %p711_p12 = por %p111_p8, %p39_p3  ;;  %s137_s26 = sand.u32 1, %s627_s14  }
  0x10   : > { %s822_s24 = scalar_select %p707_p11, 1, 0 }
  0x11   : > { %s823_s25 = scalar_select %p711_p12, 1, 0 }
  0x12   : > { %s471_s27 = sshll.u32 %s631_s15, 8  ;;  %s456_s28 = sshll.u32 %s137_s26, 4 }
  0x13   : > { %s720_s4 = scalar_lea.hbm %s814_s0, %s471_s27  ;;  %s141_s5 = scalar_lea.vmem [#allocation2], %s456_s28 }
  0x14   : > { %s149_s6 = sshll.u32 %s141_s5, 4  ;;  %p724_p13 = pnand %p499_p10, %p696_p5  ;;  %s728_s6 = int_to_ptr.vmem [resolvable:$true] %s149_s6 }
  0x15   : > { %s138_s8 = scalar_lea.sflag [#allocation3], %s137_s26  ;;  %s539_s9 = scalar_lea.hbm %s720_s4, 256 }
  0x16   : > { %p540_p2 = scmp.ne.s32.totalorder %s720_s4, %s539_s9  ;;  %p541_p3 = pneg %p724_p13 }
  0x17   : > { %s544_s17 = scalar_lea.hbm %s814_s0, 512  ;;  %p545_p5 = scmp.lt.s32.totalorder %s720_s4, %s814_s0 }
  0x18   : > { %p542_p4 = pnand %p541_p3, %p540_p2  ;;  %p546_p8 = scmp.lt.s32.totalorder %s544_s17, %s539_s9 }
  0x1a   : > { %p543_p7 = pneg %p542_p4  ;;  %p547_p10 = por %p546_p8, %p545_p5 }
  0x1c   : > { %p548_p9 = pnand %p547_p10, %p543_p7 }
  0x1e   : > { %551 = shalt.err (!%p548_p9)
}
  0x1f   : > { %s552_s22 = scalar_lea.vmem %s728_s6, 256  ;;  %s633_s26 = smov [#allocation2]  }
  0x20   : > { %p553_p0 = scmp.ne.s32.totalorder %s728_s6, %s552_s22  ;;  %s557_s27 = sshll.u32 %s633_s26, 4  ;;  %s558_s27 = int_to_ptr.vmem [resolvable:$false] %s557_s27 }
  0x21   : > { %s559_s28 = scalar_lea.vmem %s558_s27, 512  ;;  %p560_p4 = scmp.lt.s32.totalorder %s728_s6, %s558_s27 }
  0x22   : > { %p555_p1 = pnand %p553_p0, %p541_p3  ;;  %p561_p12 = scmp.lt.s32.totalorder %s559_s28, %s552_s22 }
  0x24   : > { %p556_p2 = pneg %p555_p1  ;;  %p562_p11 = por %p561_p12, %p560_p4 }
  0x26   : > { %p563_p6 = pnand %p562_p11, %p556_p2 }
  0x28   : > { %566 = shalt.err (!%p563_p6)
}
  0x29   : > { %494 = dma.hbm_to_vmem [thread:$0]  (!%p724_p13), %s720_s4, 256, %s728_s6, %s138_s8  }
  0x2a   : > { %p825_p9 = scmp.lt.s32.totalorder %s631_s15, 3  ;;  %p826_p7 = scmp.ge.s32.totalorder %s631_s15, 1 }
  0x2c   : > { %p155_p0 = pnand %p826_p7, %p825_p9 }
  0x2d   : > { %s755_s29 = sand.u32 (!%p155_p0), 1, %s623_s13   ;;  %p827_p6 = scmp.ne.s32.totalorder (!%p155_p0), %s821_s23, 0 }
  0x2e   : > { %158 = sbr.rel (%p155_p0) target bundleno = 774 (0x306), region = 32  ;;  %s460_s30 = sshll.u32 (!%p155_p0), %s755_s29, 4 }
  0x2f   : > { %s161_s5 = scalar_lea.sflag (!%p155_p0), [#allocation3], %s755_s29  ;;  %s164_s7 = scalar_lea.vmem (!%p155_p0), [#allocation2], %s460_s30 }
  0x33   : > { %610 = dma.done.wait (%p827_p6), %s161_s5, 256  }
  0x34   : > { %612 = vsyncadd (%p827_p6), %s161_s5, 4294967040  ;;  %v187_v0 = vld [vmem:[%s164_s7] sm:$0xff]  ;;  %v188_v1 = vld [vmem:[%s164_s7 + $0x8] sm:$0xff]  ;;  %v634_v4 = vmov 0.0   ;;  %vm635_vm0 = vmmov 0   ;;  %v197_v5 = vlaneseq  ;;  %vm202_vm2 = vcmask 64512  }
  0x35   : > { %v192_v2 = vadd.f32 %v188_v1, %v187_v0  ;;  %v189_v3 = vmax.f32 %v187_v0, %v188_v1  ;;  %477 = vmatprep.subr.mxu0 %v634_v4  ;;  %482 = vmatprep.subr.mxu1 %v634_v4  ;;  %v195_v10 = vld [vmem:[%s815_s1] sm:$0x3]  ;;  %vm281_vm3 = vcmask 1041408   ;;  %vm277_vm4 = vcmask 15360   ;;  %s472_s9 = sshll.u32 %s678_s16, 8  ;;  %s186_s10 = scalar_lea.vmem [#allocation5], %s460_s30 }
  0x36   : > { %479 = vmatprep.mubr.msk.f32.mxu0 %vm635_vm0, %v634_v4  ;;  %484 = vmatprep.mubr.msk.f32.mxu1 %vm635_vm0, %v634_v4  ;;  %v198_v6 = vand.u32 127, %v197_v5  ;;  %v196_v14 = vld [vmem:[%s816_s2] sm:$0xff]  ;;  %s383_s11 = sshll.u32 %s186_s10, 4  ;;  %s777_s20 = scalar_lea.hbm %s817_s3, %s472_s9  ;;  %s384_s11 = int_to_ptr.vmem [resolvable:$true] %s383_s11 }
  0x37   : > { %193 = vadd.xlane.f32.xlu0 %v192_v2  ;;  %s369_s22 = scalar_lea.sflag [#allocation4], %s755_s29  ;;  %s567_s26 = scalar_lea.vmem %s384_s11, 256 }
  0x38   : > { %vm199_vm1 = vcmp.eq.s32.totalorder %v198_v6, 0  ;;  %p568_p11 = scmp.ne.s32.totalorder %s384_s11, %s567_s26  ;;  %p828_p12 = scmp.ne.s32.totalorder %s822_s24, 0 }
  0x39   : > { %s636_s16 = smov [#allocation5]  }
  0x3a   : > { %p569_p13 = pnand %p568_p11, %p828_p12  ;;  %s571_s27 = sshll.u32 %s636_s16, 4  ;;  %s572_s27 = int_to_ptr.vmem [resolvable:$false] %s571_s27 }
  0x3b   : > { %190 = vmax.xlane.f32.xlu0 %v189_v3  ;;  %s573_s28 = scalar_lea.vmem %s572_s27, 512  ;;  %p574_p3 = scmp.lt.s32.totalorder %s384_s11, %s572_s27 }
  0x3c   : > { %p570_p1 = pneg %p569_p13  ;;  %p575_p5 = scmp.lt.s32.totalorder %s573_s28, %s567_s26 }
  0x3e   : > { %p576_p8 = por %p575_p5, %p574_p3 }
  0x40   : > { %p577_p10 = pnand %p576_p8, %p570_p1 }
  0xc0   : > { %v194_v7 = vpop.xlane.xlu0 %193 }
  0xc1   : > { %v200_v8 = vmul.f32 0.00390625, %v194_v7 }
  0xc4   : > { %v191_v9 = vpop.xlane.xlu0 %190 }
  0xc5   : > { %v201_v11 = vsel %vm199_vm1, %v191_v9, %v200_v8 }
  0xc6   : > { %478 = vmatpush3.msra.mxu0 %v201_v11 }
  0xc7   : > { %480 = vmatmul.mubr.msk.f32.vlgmr.msra.gmra.mxu0 %vm202_vm2, %v195_v10 }
 0x187   : > { %v272_v12 = vpop.f32.mrf.mxu0 }
 0x188   : > { %v276_v13 = vmax.f32 %v272_v12, 0.0 }
 0x189   : > { %v481_v15 = vpop.f32.mrf.mxu0 }
 0x18a   : > { %483 = vmatpush3.msk.msra.mxu1 %vm281_vm3, %v276_v13 }
 0x18b   : > { %485 = vmatmul.mubr.msk.f32.vlgmr.msra.gmra.mxu1 %vm277_vm4, %v196_v14 }
 0x24b   : > { %v351_v16 = vpop.f32.mrf.mxu1 }
 0x24c   : > { %v355_v17 = vsel %vm277_vm4, %v351_v16, 0.0 }
 0x24d   : > { %356 = vadd.xlane.f32.xlu1 %v355_v17  ;;  %v486_v18 = vpop.f32.mrf.mxu1 }
 0x2d6   : > { %v357_v19 = vpop.xlane.xlu1 %356 }
 0x2d7   : > { %v465_v20 = vmul.f32 -1.442695, %v357_v19 }
 0x2d9   : > { %535 = vpow2.f32 %v465_v20 }
 0x2e6   : > { %v536_v21 = vpop.eup %535 }
 0x2e7   : > { %v361_v22 = vadd.f32 1.0, %v536_v21 }
 0x2e9   : > { %537 = vrcp.f32 %v361_v22 }
 0x2f6   : > { %v538_v23 = vpop.eup %537 }
 0x2f7   : > { %v364_v24 = vmul.f32 %v538_v23, %v187_v0  ;;  %v365_v25 = vmul.f32 %v538_v23, %v188_v1 }
 0x2f9   : > { %366 = vst [vmem:[%s186_s10] sm:$0xff] %v364_v24  ;;  %367 = vst [vmem:[%s186_s10 + $0x8] sm:$0xff] %v365_v25 }
 0x2fa   : > { %580 = shalt.err (!%p577_p10)
}
 0x2fb   : > { %s581_s30 = scalar_lea.hbm %s777_s20, 256  ;;  %s585_s7 = scalar_lea.hbm %s817_s3, 512 }
 0x2fc   : > { %p582_p2 = scmp.ne.s32.totalorder %s777_s20, %s581_s30  ;;  %p586_p7 = scmp.lt.s32.totalorder %s777_s20, %s817_s3 }
 0x2fd   : > { %p587_p0 = scmp.lt.s32.totalorder %s585_s7, %s581_s30 }
 0x2fe   : > { %p583_p4 = pnand %p582_p2, %p828_p12 }
 0x2ff   : > { %p588_p6 = por %p587_p0, %p586_p7 }
 0x300   : > { %p584_p9 = pneg %p583_p4 }
 0x302   : > { %p589_p11 = pnand %p588_p6, %p584_p9 }
 0x304   : > { %592 = shalt.err (!%p589_p11)
}
 0x305   : > { %489 = dma.vmem_to_hbm [thread:$0]  (%p828_p12), %s384_s11, 256, %s777_s20, %s369_s22  }
 0x306 PF: > { %s395_s6 = sand.u32 1, %s619_s12   ;;  %p829_p13 = scmp.ne.s32.totalorder %s823_s25, 0 }
 0x307   : > { %p830_p1 = scmp.ge.s32.totalorder %s631_s15, 2  ;;  %s396_s8 = scalar_lea.sflag [#allocation4], %s395_s6 }
 0x309   : > { %p496_p3 = pnand %p830_p1, %p829_p13 }
 0x30b   : > { %p497_p5 = pneg %p496_p3 }
 0x30d   : > { %614 = dma.done.wait (%p497_p5), %s396_s8, 256  }
 0x30e   : > { %616 = vsyncadd (%p497_p5), %s396_s8, 4294967040  ;;  %p16_p8 = scmp.ge.s32.totalorder %s682_s18, 4   ;;  %s831_s12 = smov %s623_s13 }
 0x30f   : > { %s832_s13 = smov %s627_s14  ;;  %s833_s14 = smov %s694_s21 }
 0x310   : > { %s834_s15 = smov %s682_s18  ;;  %18 = sbr.rel (!%p16_p8) target bundleno = 5 (0x5), region = 77 }
 0x315   :  { %401 = vsyncpa [#allocation3], 1 }
 0x316   :  { %403 = vsyncpa [#allocation3 + $0x1], 1 }
 0x317   :  { %404 = vsyncpa [#allocation4], 1 }
 0x318   :  { %406 = vsyncpa [#allocation4 + $0x1], 1 }

</bundles_post_ra>
